<compile_context>
chip_gen: v6e
topology: v6e:2x2x1
jax: 0.10.0
libtpu: 0.0.40
codegen_flags: <defaults>
</compile_context>

<pallas_src>
import jax
import jax.numpy as jnp
from jax import lax
from jax.experimental import pallas as pl
from jax.experimental.pallas import tpu as pltpu

# ----------------------------- model constants -----------------------------
DEP_DIM = 5
DIR_DIM = 1
EMBEDDING_DIM = 300          # hardcoded in the module
POS_DIM = 4
NUM_RELATIONS = 5            # len(relations)
HIDDEN_DIM = 32              # sys.argv[1] in the original; small value here
NUM_LAYERS = 2               # sys.argv[2] in the original; small value here
INPUT_DIM = POS_DIM + DEP_DIM + EMBEDDING_DIM + DIR_DIM          # 310
INPUT_DIM_PAD = ((INPUT_DIM + 127) // 128) * 128                 # 384 (clean lane tiles)
CAT_DIM = HIDDEN_DIM + 2 * EMBEDDING_DIM                         # 632


# --------------------------- fused forward kernel ---------------------------
def make_fused_kernel(num_layers, p_pad, seq_len, hidden):
    """Fused kernel: multi-layer LSTM + count-weighted aggregation + Linear + LogSoftmax."""
    P = p_pad                 # padded paths axis (multiple of 8)
    H = hidden
    H4 = 4 * H

    def kernel(*refs):
        # ---- unpack refs: inputs..., output, scratch ----
        x_ref, wih0_ref, whh0_ref, b0_ref = refs[0:4]
        pos = 4
        upper_refs = []
        for _ in range(num_layers - 1):
            upper_refs.append((refs[pos], refs[pos + 1]))
            pos += 2
        base_ref, scnt_ref, wp_ref = refs[pos:pos + 3]
        out_ref = refs[pos + 3]
        gates_sc = refs[pos + 4]                       # VMEM (L*Ppad, 4H) f32 scratch

        # ---- prologue: hoisted layer-0 input projection (one big bf16 MXU matmul) ----
        # x_ref: (L*Ppad, 384) bf16, time-major (rows [t*Ppad:(t+1)*Ppad] are timestep t).
        gates_sc[...] = jnp.dot(x_ref[...], wih0_ref[...],
                                preferred_element_type=jnp.float32) + b0_ref[...]

        # hoist weight/bias loads out of the recurrence (all recurrent weights bf16)
        whh0 = whh0_ref[...]                                   # (H, 4H) bf16
        upper_w = [w_ref[...] for (w_ref, _) in upper_refs]    # (2H, 4H) bf16 each
        upper_b = [b_ref[...] for (_, b_ref) in upper_refs]    # (1, 4H) f32 each

        def cell(gates, c_prev):
            # Full-width activations over the 4H=128-lane gate vector (2 EUP pushes/step).
            # Torch gate order i, f, g, o.  Elementwise state math stays in f32.
            sig = jax.nn.sigmoid(gates)
            tg = jnp.tanh(gates)
            i = sig[:, 0:H]
            f = sig[:, H:2 * H]
            o = sig[:, 3 * H:4 * H]
            g = tg[:, 2 * H:3 * H]
            c = f * c_prev + i * g
            h = o * jnp.tanh(c)
            return h, c

        def step(t, carry):
            hs, cs = carry
            # layer 0: aligned precomputed-gate slice + bf16 recurrent matmul
            base = pl.multiple_of(t * P, P)                    # P is a multiple of 8
            g = gates_sc[pl.ds(base, P), :] + jnp.dot(
                hs[0].astype(jnp.bfloat16), whh0, preferred_element_type=jnp.float32)
            h, c = cell(g, cs[0])
            new_hs, new_cs = [h], [c]
            inp = h
            # upper layers: single fused bf16 matmul of [x_t | h_{t-1}] @ [Wih; Whh]
            for li in range(1, num_layers):
                xh = jnp.concatenate([inp, hs[li]], axis=-1).astype(jnp.bfloat16)  # (P, 2H)
                g = jnp.dot(xh, upper_w[li - 1],
                            preferred_element_type=jnp.float32) + upper_b[li - 1]
                h, c = cell(g, cs[li])
                new_hs.append(h)
                new_cs.append(c)
                inp = h
            return (tuple(new_hs), tuple(new_cs))

        zero_state = tuple(jnp.zeros((P, H), jnp.float32) for _ in range(num_layers))
        hs, _ = lax.fori_loop(0, seq_len, step, (zero_state, zero_state), unroll=True)
        h_top = hs[-1]                                  # (Ppad, H): last timestep, top layer

        # ---- classifier epilogue (fused) ----
        # count-weighted segment sum over paths via a tiny MXU matmul (pad columns are 0):
        scnt = scnt_ref[...]                            # (N, Ppad) f32
        num = jnp.dot(scnt, h_top, preferred_element_type=jnp.float32)   # (N, H)
        denom = jnp.sum(scnt, axis=-1, keepdims=True)                    # (N, 1)
        agg = num / denom                               # exact weighted mean (off crit path)

        # cat(x, path_emb, y) @ W.T + b == base_logits + agg @ Wp (base hoisted to wrapper)
        logits = base_ref[...] + jnp.dot(agg, wp_ref[...],
                                         preferred_element_type=jnp.float32)     # (N, R)

        # LogSoftmax over relations
        m = jnp.max(logits, axis=-1, keepdims=True)
        z = logits - m
        lse = jnp.log(jnp.sum(jnp.exp(z), axis=-1, keepdims=True))
        out_ref[...] = (z - lse).astype(out_ref.dtype)

    return kernel


# ----------------------------- full forward (glue) ---------------------------
def lstm_model_forward(params, edges, counts, pairs):
    """
    edges:  (N, K, L, 4) int32  — per-edge (word, pos, dep, dir) indices
    counts: (N, K)       f32    — path multiplicities
    pairs:  (N, 2)       int32  — (x, y) word indices per data item
    returns (N, NUM_RELATIONS) log-probabilities
    """
    N, K, L, _ = edges.shape
    P = N * K
    Ppad = ((P + 7) // 8) * 8                                         # sublane-aligned paths axis
    H = params["lstm"][0]["whh_t"].shape[0]
    num_layers = len(params["lstm"])

    # Tiny int32 index tensor goes time-major BEFORE the gathers, so the big embedded
    # tensor is produced directly in (L, P, feat) layout — no HBM relayout of it.
    e = jnp.transpose(edges.reshape(P, L, 4), (1, 0, 2))              # (L, P, 4) int32
    w_emb = jnp.take(params["word_emb"], e[..., 0], axis=0)           # (L, P, E)
    p_emb = jnp.take(params["pos_emb"], e[..., 1], axis=0)            # (L, P, 4)
    d_emb = jnp.take(params["dep_emb"], e[..., 2], axis=0)            # (L, P, 5)
    r_emb = jnp.take(params["dir_emb"], e[..., 3], axis=0)            # (L, P, 1)
    x3 = jnp.concatenate([w_emb, p_emb, d_emb, r_emb], axis=-1)       # (L, P, 310)
    # zero-pad paths -> Ppad (aligned gate scratch) and features -> 384 (clean lane tiles)
    x3 = jnp.pad(x3, ((0, 0), (0, Ppad - P), (0, INPUT_DIM_PAD - INPUT_DIM)))
    x2d = x3.reshape(L * Ppad, INPUT_DIM_PAD).astype(jnp.bfloat16)    # time-major rows

    # pair word embeddings; LSTM-independent classifier term precomputed here (hoisted)
    x_word = jnp.take(params["word_emb"], pairs[:, 0], axis=0)        # (N, E)
    y_word = jnp.take(params["word_emb"], pairs[:, 1], axis=0)        # (N, E)
    base_logits = (jnp.dot(x_word, params["wx"]) + jnp.dot(y_word, params["wy"])
                   + params["wb"]).astype(jnp.float32)                # (N, R)

    # count-weighted pair-selection matrix for the in-kernel segment sum (pad cols = 0)
    counts_f = counts.astype(jnp.float32).reshape(-1)                 # (P,)
    sel = jnp.repeat(jnp.eye(N, dtype=jnp.float32), K, axis=1)        # (N, P)
    s_cnt = jnp.pad(sel * counts_f[None, :], ((0, 0), (0, Ppad - P))) # (N, Ppad)

    # kernel-ready LSTM weights (all MXU operands in bf16)
    lyr0 = params["lstm"][0]
    wih0_pad = jnp.pad(lyr0["wih_t"],
                       ((0, INPUT_DIM_PAD - INPUT_DIM), (0, 0))).astype(jnp.bfloat16)
    args = [x2d,
            wih0_pad,                                 # (384, 4H) bf16
            lyr0["whh_t"].astype(jnp.bfloat16),       # (H, 4H)  bf16
            lyr0["b"]]                                # (1, 4H)  f32
    for lyr in params["lstm"][1:]:
        args.append(jnp.concatenate([lyr["wih_t"], lyr["whh_t"]],
                                    axis=0).astype(jnp.bfloat16))     # (2H, 4H) bf16
        args.append(lyr["b"])                                          # (1, 4H) f32
    args += [base_logits, s_cnt, params["wp"]]

    kernel = make_fused_kernel(num_layers, Ppad, L, H)
    return pl.pallas_call(
        kernel,
        out_shape=jax.ShapeDtypeStruct((N, NUM_RELATIONS), jnp.float32),
        scratch_shapes=[pltpu.VMEM((L * Ppad, 4 * H), jnp.float32)],
    )(*args)


# ----------------------------- pure-JAX reference ----------------------------
def reference_forward(params, edges, counts, pairs):
    N, K, L, _ = edges.shape
    P = N * K
    e = edges.reshape(P, L, 4)
    x = jnp.concatenate([
        jnp.take(params["word_emb"], e[..., 0], axis=0),
        jnp.take(params["pos_emb"], e[..., 1], axis=0),
        jnp.take(params["dep_emb"], e[..., 2], axis=0),
        jnp.take(params["dir_emb"], e[..., 3], axis=0)], axis=-1)     # (P, L, 310)

    def run_layer(seq, lyr):
        H = lyr["whh_t"].shape[0]
        def step(carry, xt):
            h, c = carry
            g = xt @ lyr["wih_t"] + h @ lyr["whh_t"] + lyr["b"]
            i = jax.nn.sigmoid(g[:, :H]); f = jax.nn.sigmoid(g[:, H:2 * H])
            gg = jnp.tanh(g[:, 2 * H:3 * H]); o = jax.nn.sigmoid(g[:, 3 * H:])
            c = f * c + i * gg
            h = o * jnp.tanh(c)
            return (h, c), h
        z = jnp.zeros((seq.shape[0], H), jnp.float32)
        (_, _), hs = lax.scan(step, (z, z), jnp.swapaxes(seq, 0, 1))
        return jnp.swapaxes(hs, 0, 1)

    out = x
    for lyr in params["lstm"]:
        out = run_layer(out, lyr)
    h_last = out[:, -1, :]                                            # (P, H)
    cnt = counts.astype(jnp.float32)
    agg = ((h_last * cnt.reshape(P, 1)).reshape(N, K, -1).sum(1)
           / cnt.sum(axis=1, keepdims=True))
    x_w = jnp.take(params["word_emb"], pairs[:, 0], axis=0)
    y_w = jnp.take(params["word_emb"], pairs[:, 1], axis=0)
    logits = x_w @ params["wx"] + agg @ params["wp"] + y_w @ params["wy"] + params["wb"]
    return jax.nn.log_softmax(logits, axis=-1)


# ----------------------------- parameter construction ------------------------
def make_params(key, vocab_word=20, vocab_pos=8, vocab_dep=6, vocab_dir=3):
    ks = iter(jax.random.split(key, 32))
    p = {}
    p["word_emb"] = jax.random.normal(next(ks), (vocab_word, EMBEDDING_DIM), jnp.float32) * 0.1
    p["pos_emb"] = jax.random.normal(next(ks), (vocab_pos, POS_DIM), jnp.float32) * 0.1
    p["dep_emb"] = jax.random.normal(next(ks), (vocab_dep, DEP_DIM), jnp.float32) * 0.1
    p["dir_emb"] = jax.random.normal(next(ks), (vocab_dir, DIR_DIM), jnp.float32) * 0.1

    layers = []
    for l in range(NUM_LAYERS):
        din = INPUT_DIM if l == 0 else HIDDEN_DIM
        wih = jax.random.normal(next(ks), (4 * HIDDEN_DIM, din), jnp.float32) * 0.1
        whh = jax.random.normal(next(ks), (4 * HIDDEN_DIM, HIDDEN_DIM), jnp.float32) * 0.1
        bih = jax.random.normal(next(ks), (4 * HIDDEN_DIM,), jnp.float32) * 0.1
        bhh = jax.random.normal(next(ks), (4 * HIDDEN_DIM,), jnp.float32) * 0.1
        layers.append({"wih_t": wih.T, "whh_t": whh.T, "b": (bih + bhh)[None, :]})
    p["lstm"] = layers

    # final Linear(CAT_DIM -> NUM_RELATIONS), split along the concat order (x, path_emb, y)
    w = jax.random.normal(next(ks), (NUM_RELATIONS, CAT_DIM), jnp.float32) * 0.05
    b = jax.random.normal(next(ks), (NUM_RELATIONS,), jnp.float32) * 0.05
    p["wx"] = w[:, :EMBEDDING_DIM].T                              # (E, R)
    p["wp"] = w[:, EMBEDDING_DIM:EMBEDDING_DIM + HIDDEN_DIM].T    # (H, R)
    p["wy"] = w[:, EMBEDDING_DIM + HIDDEN_DIM:].T                 # (E, R)
    p["wb"] = b[None, :]                                          # (1, R)
    return p


if __name__ == "__main__":
    key = jax.random.PRNGKey(0)
    kp, kd = jax.random.split(key)
    params = make_params(kp)

    # synthetic "data": N term-pairs, K dependency paths each, L edges per path
    N, K, L = 2, 3, 4
    k1, k2, k3, k4, k5, k6 = jax.random.split(kd, 6)
    edges = jnp.stack([
        jax.random.randint(k1, (N, K, L), 0, 20),   # word idx
        jax.random.randint(k2, (N, K, L), 0, 8),    # pos idx
        jax.random.randint(k3, (N, K, L), 0, 6),    # dep idx
        jax.random.randint(k4, (N, K, L), 0, 3),    # dir idx
    ], axis=-1).astype(jnp.int32)
    counts = jax.random.randint(k5, (N, K), 1, 4).astype(jnp.float32)
    pairs = jax.random.randint(k6, (N, 2), 0, 20).astype(jnp.int32)

    h = jax.jit(lstm_model_forward)(params, edges, counts, pairs)
    h = jax.block_until_ready(h)

    assert h.shape == (N, NUM_RELATIONS)
    assert bool(jnp.all(jnp.isfinite(h)))
    # rows of LogSoftmax should exp-sum to 1
    assert bool(jnp.allclose(jnp.sum(jnp.exp(h), axis=-1), 1.0, atol=1e-4))
    # end-to-end tolerance check against the pure-JAX f32 reference (bf16 MXU operands)
    ref = reference_forward(params, edges, counts, pairs)
    assert bool(jnp.allclose(h, ref, atol=2e-2)), float(jnp.max(jnp.abs(h - ref)))
    print("KERNEL_OK")
</pallas_src>

<mosaic_0001>
module attributes {stable_mosaic.version = 11 : i64} {
  func.func @kernel(%arg0: memref<32x384xbf16, #tpu.memory_space<vmem>>, %arg1: memref<384x128xbf16, #tpu.memory_space<vmem>>, %arg2: memref<32x128xbf16, #tpu.memory_space<vmem>>, %arg3: memref<1x128xf32, #tpu.memory_space<vmem>>, %arg4: memref<64x128xbf16, #tpu.memory_space<vmem>>, %arg5: memref<1x128xf32, #tpu.memory_space<vmem>>, %arg6: memref<2x5xf32, #tpu.memory_space<vmem>>, %arg7: memref<2x8xf32, #tpu.memory_space<vmem>>, %arg8: memref<32x5xf32, #tpu.memory_space<vmem>>, %arg9: memref<2x5xf32, #tpu.memory_space<vmem>>, %arg10: memref<32x128xf32, #tpu.memory_space<vmem>>) attributes {dimension_semantics = [], scalar_prefetch = 0 : i64, scratch_operands = 1 : i64, tpu.core_type = #tpu.core_type<tc>} {
    %c0 = arith.constant 0 : index
    %c0_0 = arith.constant 0 : index
    %0 = vector.load %arg0[%c0, %c0_0] : memref<32x384xbf16, #tpu.memory_space<vmem>>, vector<32x384xbf16>
    %c0_1 = arith.constant 0 : index
    %c0_2 = arith.constant 0 : index
    %1 = vector.load %arg1[%c0_1, %c0_2] : memref<384x128xbf16, #tpu.memory_space<vmem>>, vector<384x128xbf16>
    %cst = arith.constant dense<0.000000e+00> : vector<32x128xf32>
    %2 = tpu.matmul %0, %1, %cst {dimension_numbers = #tpu.dot_dimension_numbers<[1], [0], [0], [1], [0, 0, 1, 1], [], []>} : vector<32x384xbf16>, vector<384x128xbf16>, vector<32x128xf32> -> vector<32x128xf32>
    %c0_3 = arith.constant 0 : index
    %c0_4 = arith.constant 0 : index
    %3 = vector.load %arg3[%c0_3, %c0_4] : memref<1x128xf32, #tpu.memory_space<vmem>>, vector<1x128xf32>
    %4 = vector.broadcast %3 : vector<1x128xf32> to vector<32x128xf32>
    %5 = arith.addf %2, %4 : vector<32x128xf32>
    %c0_5 = arith.constant 0 : index
    %c0_6 = arith.constant 0 : index
    %6 = vector.load %arg10[%c0_5, %c0_6] : memref<32x128xf32, #tpu.memory_space<vmem>>, vector<32x128xf32>
    tpu.vector_store %arg10[%c0_5, %c0_6], %5 {strides = array<i32>} : memref<32x128xf32, #tpu.memory_space<vmem>>, vector<32x128xf32>,
    %c0_7 = arith.constant 0 : index
    %c0_8 = arith.constant 0 : index
    %7 = vector.load %arg2[%c0_7, %c0_8] : memref<32x128xbf16, #tpu.memory_space<vmem>>, vector<32x128xbf16>
    %c0_9 = arith.constant 0 : index
    %c0_10 = arith.constant 0 : index
    %8 = vector.load %arg4[%c0_9, %c0_10] : memref<64x128xbf16, #tpu.memory_space<vmem>>, vector<64x128xbf16>
    %c0_11 = arith.constant 0 : index
    %c0_12 = arith.constant 0 : index
    %9 = vector.load %arg5[%c0_11, %c0_12] : memref<1x128xf32, #tpu.memory_space<vmem>>, vector<1x128xf32>
    %cst_13 = arith.constant 0.000000e+00 : f32
    %10 = vector.broadcast %cst_13 : f32 to vector<8x32xf32>
    %cst_14 = arith.constant 0.000000e+00 : f32
    %11 = vector.broadcast %cst_14 : f32 to vector<8x32xf32>
    %c0_i32 = arith.constant 0 : i32
    %c8_i32 = arith.constant 8 : i32
    %12 = arith.muli %c0_i32, %c8_i32 : i32
    %13 = tpu.assume_multiple %12, 8 : i32
    %14 = arith.index_cast %13 : i32 to index
    %c0_15 = arith.constant 0 : index
    %15 = vector.load %arg10[%14, %c0_15] : memref<32x128xf32, #tpu.memory_space<vmem>>, vector<8x128xf32>
    %16 = arith.truncf %10 : vector<8x32xf32> to vector<8x32xbf16>
    %cst_16 = arith.constant dense<0.000000e+00> : vector<8x128xf32>
    %17 = tpu.matmul %16, %7, %cst_16 {dimension_numbers = #tpu.dot_dimension_numbers<[1], [0], [0], [1], [0, 0, 1, 1], [], []>} : vector<8x32xbf16>, vector<32x128xbf16>, vector<8x128xf32> -> vector<8x128xf32>
    %18 = arith.addf %15, %17 : vector<8x128xf32>
    %19 = arith.negf %18 : vector<8x128xf32>
    %20 = math.exp %19 : vector<8x128xf32>
    %cst_17 = arith.constant 1.000000e+00 : f32
    %21 = vector.broadcast %cst_17 : f32 to vector<8x128xf32>
    %22 = arith.addf %21, %20 : vector<8x128xf32>
    %23 = arith.divf %21, %22 : vector<8x128xf32>
    %24 = math.tanh %18 : vector<8x128xf32>
    %25 = vector.extract_strided_slice %23 {offsets = [0, 0], sizes = [8, 32], strides = [1, 1]} : vector<8x128xf32> to vector<8x32xf32>
    %26 = vector.extract_strided_slice %23 {offsets = [0, 32], sizes = [8, 32], strides = [1, 1]} : vector<8x128xf32> to vector<8x32xf32>
    %27 = vector.extract_strided_slice %23 {offsets = [0, 96], sizes = [8, 32], strides = [1, 1]} : vector<8x128xf32> to vector<8x32xf32>
    %28 = vector.extract_strided_slice %24 {offsets = [0, 64], sizes = [8, 32], strides = [1, 1]} : vector<8x128xf32> to vector<8x32xf32>
    %29 = arith.mulf %26, %10 : vector<8x32xf32>
    %30 = arith.mulf %25, %28 : vector<8x32xf32>
    %31 = arith.addf %29, %30 : vector<8x32xf32>
    %32 = math.tanh %31 : vector<8x32xf32>
    %33 = arith.mulf %27, %32 : vector<8x32xf32>
    %34 = tpu.concatenate %33, %11 in 1 : vector<8x32xf32>, vector<8x32xf32> -> vector<8x64xf32>
    %35 = arith.truncf %34 : vector<8x64xf32> to vector<8x64xbf16>
    %cst_18 = arith.constant dense<0.000000e+00> : vector<8x128xf32>
    %36 = tpu.matmul %35, %8, %cst_18 {dimension_numbers = #tpu.dot_dimension_numbers<[1], [0], [0], [1], [0, 0, 1, 1], [], []>} : vector<8x64xbf16>, vector<64x128xbf16>, vector<8x128xf32> -> vector<8x128xf32>
    %37 = vector.broadcast %9 : vector<1x128xf32> to vector<8x128xf32>
    %38 = arith.addf %36, %37 : vector<8x128xf32>
    %39 = arith.negf %38 : vector<8x128xf32>
    %40 = math.exp %39 : vector<8x128xf32>
    %cst_19 = arith.constant 1.000000e+00 : f32
    %41 = vector.broadcast %cst_19 : f32 to vector<8x128xf32>
    %42 = arith.addf %41, %40 : vector<8x128xf32>
    %43 = arith.divf %41, %42 : vector<8x128xf32>
    %44 = math.tanh %38 : vector<8x128xf32>
    %45 = vector.extract_strided_slice %43 {offsets = [0, 0], sizes = [8, 32], strides = [1, 1]} : vector<8x128xf32> to vector<8x32xf32>
    %46 = vector.extract_strided_slice %43 {offsets = [0, 32], sizes = [8, 32], strides = [1, 1]} : vector<8x128xf32> to vector<8x32xf32>
    %47 = vector.extract_strided_slice %43 {offsets = [0, 96], sizes = [8, 32], strides = [1, 1]} : vector<8x128xf32> to vector<8x32xf32>
    %48 = vector.extract_strided_slice %44 {offsets = [0, 64], sizes = [8, 32], strides = [1, 1]} : vector<8x128xf32> to vector<8x32xf32>
    %49 = arith.mulf %46, %11 : vector<8x32xf32>
    %50 = arith.mulf %45, %48 : vector<8x32xf32>
    %51 = arith.addf %49, %50 : vector<8x32xf32>
    %52 = math.tanh %51 : vector<8x32xf32>
    %53 = arith.mulf %47, %52 : vector<8x32xf32>
    %c1_i32 = arith.constant 1 : i32
    %c8_i32_20 = arith.constant 8 : i32
    %54 = arith.muli %c1_i32, %c8_i32_20 : i32
    %55 = tpu.assume_multiple %54, 8 : i32
    %56 = arith.index_cast %55 : i32 to index
    %c0_21 = arith.constant 0 : index
    %57 = vector.load %arg10[%56, %c0_21] : memref<32x128xf32, #tpu.memory_space<vmem>>, vector<8x128xf32>
    %58 = arith.truncf %33 : vector<8x32xf32> to vector<8x32xbf16>
    %cst_22 = arith.constant dense<0.000000e+00> : vector<8x128xf32>
    %59 = tpu.matmul %58, %7, %cst_22 {dimension_numbers = #tpu.dot_dimension_numbers<[1], [0], [0], [1], [0, 0, 1, 1], [], []>} : vector<8x32xbf16>, vector<32x128xbf16>, vector<8x128xf32> -> vector<8x128xf32>
    %60 = arith.addf %57, %59 : vector<8x128xf32>
    %61 = arith.negf %60 : vector<8x128xf32>
    %62 = math.exp %61 : vector<8x128xf32>
    %cst_23 = arith.constant 1.000000e+00 : f32
    %63 = vector.broadcast %cst_23 : f32 to vector<8x128xf32>
    %64 = arith.addf %63, %62 : vector<8x128xf32>
    %65 = arith.divf %63, %64 : vector<8x128xf32>
    %66 = math.tanh %60 : vector<8x128xf32>
    %67 = vector.extract_strided_slice %65 {offsets = [0, 0], sizes = [8, 32], strides = [1, 1]} : vector<8x128xf32> to vector<8x32xf32>
    %68 = vector.extract_strided_slice %65 {offsets = [0, 32], sizes = [8, 32], strides = [1, 1]} : vector<8x128xf32> to vector<8x32xf32>
    %69 = vector.extract_strided_slice %65 {offsets = [0, 96], sizes = [8, 32], strides = [1, 1]} : vector<8x128xf32> to vector<8x32xf32>
    %70 = vector.extract_strided_slice %66 {offsets = [0, 64], sizes = [8, 32], strides = [1, 1]} : vector<8x128xf32> to vector<8x32xf32>
    %71 = arith.mulf %68, %31 : vector<8x32xf32>
    %72 = arith.mulf %67, %70 : vector<8x32xf32>
    %73 = arith.addf %71, %72 : vector<8x32xf32>
    %74 = math.tanh %73 : vector<8x32xf32>
    %75 = arith.mulf %69, %74 : vector<8x32xf32>
    %76 = tpu.concatenate %75, %53 in 1 : vector<8x32xf32>, vector<8x32xf32> -> vector<8x64xf32>
    %77 = arith.truncf %76 : vector<8x64xf32> to vector<8x64xbf16>
    %cst_24 = arith.constant dense<0.000000e+00> : vector<8x128xf32>
    %78 = tpu.matmul %77, %8, %cst_24 {dimension_numbers = #tpu.dot_dimension_numbers<[1], [0], [0], [1], [0, 0, 1, 1], [], []>} : vector<8x64xbf16>, vector<64x128xbf16>, vector<8x128xf32> -> vector<8x128xf32>
    %79 = vector.broadcast %9 : vector<1x128xf32> to vector<8x128xf32>
    %80 = arith.addf %78, %79 : vector<8x128xf32>
    %81 = arith.negf %80 : vector<8x128xf32>
    %82 = math.exp %81 : vector<8x128xf32>
    %cst_25 = arith.constant 1.000000e+00 : f32
    %83 = vector.broadcast %cst_25 : f32 to vector<8x128xf32>
    %84 = arith.addf %83, %82 : vector<8x128xf32>
    %85 = arith.divf %83, %84 : vector<8x128xf32>
    %86 = math.tanh %80 : vector<8x128xf32>
    %87 = vector.extract_strided_slice %85 {offsets = [0, 0], sizes = [8, 32], strides = [1, 1]} : vector<8x128xf32> to vector<8x32xf32>
    %88 = vector.extract_strided_slice %85 {offsets = [0, 32], sizes = [8, 32], strides = [1, 1]} : vector<8x128xf32> to vector<8x32xf32>
    %89 = vector.extract_strided_slice %85 {offsets = [0, 96], sizes = [8, 32], strides = [1, 1]} : vector<8x128xf32> to vector<8x32xf32>
    %90 = vector.extract_strided_slice %86 {offsets = [0, 64], sizes = [8, 32], strides = [1, 1]} : vector<8x128xf32> to vector<8x32xf32>
    %91 = arith.mulf %88, %51 : vector<8x32xf32>
    %92 = arith.mulf %87, %90 : vector<8x32xf32>
    %93 = arith.addf %91, %92 : vector<8x32xf32>
    %94 = math.tanh %93 : vector<8x32xf32>
    %95 = arith.mulf %89, %94 : vector<8x32xf32>
    %c2_i32 = arith.constant 2 : i32
    %c8_i32_26 = arith.constant 8 : i32
    %96 = arith.muli %c2_i32, %c8_i32_26 : i32
    %97 = tpu.assume_multiple %96, 8 : i32
    %98 = arith.index_cast %97 : i32 to index
    %c0_27 = arith.constant 0 : index
    %99 = vector.load %arg10[%98, %c0_27] : memref<32x128xf32, #tpu.memory_space<vmem>>, vector<8x128xf32>
    %100 = arith.truncf %75 : vector<8x32xf32> to vector<8x32xbf16>
    %cst_28 = arith.constant dense<0.000000e+00> : vector<8x128xf32>
    %101 = tpu.matmul %100, %7, %cst_28 {dimension_numbers = #tpu.dot_dimension_numbers<[1], [0], [0], [1], [0, 0, 1, 1], [], []>} : vector<8x32xbf16>, vector<32x128xbf16>, vector<8x128xf32> -> vector<8x128xf32>
    %102 = arith.addf %99, %101 : vector<8x128xf32>
    %103 = arith.negf %102 : vector<8x128xf32>
    %104 = math.exp %103 : vector<8x128xf32>
    %cst_29 = arith.constant 1.000000e+00 : f32
    %105 = vector.broadcast %cst_29 : f32 to vector<8x128xf32>
    %106 = arith.addf %105, %104 : vector<8x128xf32>
    %107 = arith.divf %105, %106 : vector<8x128xf32>
    %108 = math.tanh %102 : vector<8x128xf32>
    %109 = vector.extract_strided_slice %107 {offsets = [0, 0], sizes = [8, 32], strides = [1, 1]} : vector<8x128xf32> to vector<8x32xf32>
    %110 = vector.extract_strided_slice %107 {offsets = [0, 32], sizes = [8, 32], strides = [1, 1]} : vector<8x128xf32> to vector<8x32xf32>
    %111 = vector.extract_strided_slice %107 {offsets = [0, 96], sizes = [8, 32], strides = [1, 1]} : vector<8x128xf32> to vector<8x32xf32>
    %112 = vector.extract_strided_slice %108 {offsets = [0, 64], sizes = [8, 32], strides = [1, 1]} : vector<8x128xf32> to vector<8x32xf32>
    %113 = arith.mulf %110, %73 : vector<8x32xf32>
    %114 = arith.mulf %109, %112 : vector<8x32xf32>
    %115 = arith.addf %113, %114 : vector<8x32xf32>
    %116 = math.tanh %115 : vector<8x32xf32>
    %117 = arith.mulf %111, %116 : vector<8x32xf32>
    %118 = tpu.concatenate %117, %95 in 1 : vector<8x32xf32>, vector<8x32xf32> -> vector<8x64xf32>
    %119 = arith.truncf %118 : vector<8x64xf32> to vector<8x64xbf16>
    %cst_30 = arith.constant dense<0.000000e+00> : vector<8x128xf32>
    %120 = tpu.matmul %119, %8, %cst_30 {dimension_numbers = #tpu.dot_dimension_numbers<[1], [0], [0], [1], [0, 0, 1, 1], [], []>} : vector<8x64xbf16>, vector<64x128xbf16>, vector<8x128xf32> -> vector<8x128xf32>
    %121 = vector.broadcast %9 : vector<1x128xf32> to vector<8x128xf32>
    %122 = arith.addf %120, %121 : vector<8x128xf32>
    %123 = arith.negf %122 : vector<8x128xf32>
    %124 = math.exp %123 : vector<8x128xf32>
    %cst_31 = arith.constant 1.000000e+00 : f32
    %125 = vector.broadcast %cst_31 : f32 to vector<8x128xf32>
    %126 = arith.addf %125, %124 : vector<8x128xf32>
    %127 = arith.divf %125, %126 : vector<8x128xf32>
    %128 = math.tanh %122 : vector<8x128xf32>
    %129 = vector.extract_strided_slice %127 {offsets = [0, 0], sizes = [8, 32], strides = [1, 1]} : vector<8x128xf32> to vector<8x32xf32>
    %130 = vector.extract_strided_slice %127 {offsets = [0, 32], sizes = [8, 32], strides = [1, 1]} : vector<8x128xf32> to vector<8x32xf32>
    %131 = vector.extract_strided_slice %127 {offsets = [0, 96], sizes = [8, 32], strides = [1, 1]} : vector<8x128xf32> to vector<8x32xf32>
    %132 = vector.extract_strided_slice %128 {offsets = [0, 64], sizes = [8, 32], strides = [1, 1]} : vector<8x128xf32> to vector<8x32xf32>
    %133 = arith.mulf %130, %93 : vector<8x32xf32>
    %134 = arith.mulf %129, %132 : vector<8x32xf32>
    %135 = arith.addf %133, %134 : vector<8x32xf32>
    %136 = math.tanh %135 : vector<8x32xf32>
    %137 = arith.mulf %131, %136 : vector<8x32xf32>
    %c3_i32 = arith.constant 3 : i32
    %c8_i32_32 = arith.constant 8 : i32
    %138 = arith.muli %c3_i32, %c8_i32_32 : i32
    %139 = tpu.assume_multiple %138, 8 : i32
    %140 = arith.index_cast %139 : i32 to index
    %c0_33 = arith.constant 0 : index
    %141 = vector.load %arg10[%140, %c0_33] : memref<32x128xf32, #tpu.memory_space<vmem>>, vector<8x128xf32>
    %142 = arith.truncf %117 : vector<8x32xf32> to vector<8x32xbf16>
    %cst_34 = arith.constant dense<0.000000e+00> : vector<8x128xf32>
    %143 = tpu.matmul %142, %7, %cst_34 {dimension_numbers = #tpu.dot_dimension_numbers<[1], [0], [0], [1], [0, 0, 1, 1], [], []>} : vector<8x32xbf16>, vector<32x128xbf16>, vector<8x128xf32> -> vector<8x128xf32>
    %144 = arith.addf %141, %143 : vector<8x128xf32>
    %145 = arith.negf %144 : vector<8x128xf32>
    %146 = math.exp %145 : vector<8x128xf32>
    %cst_35 = arith.constant 1.000000e+00 : f32
    %147 = vector.broadcast %cst_35 : f32 to vector<8x128xf32>
    %148 = arith.addf %147, %146 : vector<8x128xf32>
    %149 = arith.divf %147, %148 : vector<8x128xf32>
    %150 = math.tanh %144 : vector<8x128xf32>
    %151 = vector.extract_strided_slice %149 {offsets = [0, 0], sizes = [8, 32], strides = [1, 1]} : vector<8x128xf32> to vector<8x32xf32>
    %152 = vector.extract_strided_slice %149 {offsets = [0, 32], sizes = [8, 32], strides = [1, 1]} : vector<8x128xf32> to vector<8x32xf32>
    %153 = vector.extract_strided_slice %149 {offsets = [0, 96], sizes = [8, 32], strides = [1, 1]} : vector<8x128xf32> to vector<8x32xf32>
    %154 = vector.extract_strided_slice %150 {offsets = [0, 64], sizes = [8, 32], strides = [1, 1]} : vector<8x128xf32> to vector<8x32xf32>
    %155 = arith.mulf %152, %115 : vector<8x32xf32>
    %156 = arith.mulf %151, %154 : vector<8x32xf32>
    %157 = arith.addf %155, %156 : vector<8x32xf32>
    %158 = math.tanh %157 : vector<8x32xf32>
    %159 = arith.mulf %153, %158 : vector<8x32xf32>
    %160 = tpu.concatenate %159, %137 in 1 : vector<8x32xf32>, vector<8x32xf32> -> vector<8x64xf32>
    %161 = arith.truncf %160 : vector<8x64xf32> to vector<8x64xbf16>
    %cst_36 = arith.constant dense<0.000000e+00> : vector<8x128xf32>
    %162 = tpu.matmul %161, %8, %cst_36 {dimension_numbers = #tpu.dot_dimension_numbers<[1], [0], [0], [1], [0, 0, 1, 1], [], []>} : vector<8x64xbf16>, vector<64x128xbf16>, vector<8x128xf32> -> vector<8x128xf32>
    %163 = vector.broadcast %9 : vector<1x128xf32> to vector<8x128xf32>
    %164 = arith.addf %162, %163 : vector<8x128xf32>
    %165 = arith.negf %164 : vector<8x128xf32>
    %166 = math.exp %165 : vector<8x128xf32>
    %cst_37 = arith.constant 1.000000e+00 : f32
    %167 = vector.broadcast %cst_37 : f32 to vector<8x128xf32>
    %168 = arith.addf %167, %166 : vector<8x128xf32>
    %169 = arith.divf %167, %168 : vector<8x128xf32>
    %170 = math.tanh %164 : vector<8x128xf32>
    %171 = vector.extract_strided_slice %169 {offsets = [0, 0], sizes = [8, 32], strides = [1, 1]} : vector<8x128xf32> to vector<8x32xf32>
    %172 = vector.extract_strided_slice %169 {offsets = [0, 32], sizes = [8, 32], strides = [1, 1]} : vector<8x128xf32> to vector<8x32xf32>
    %173 = vector.extract_strided_slice %169 {offsets = [0, 96], sizes = [8, 32], strides = [1, 1]} : vector<8x128xf32> to vector<8x32xf32>
    %174 = vector.extract_strided_slice %170 {offsets = [0, 64], sizes = [8, 32], strides = [1, 1]} : vector<8x128xf32> to vector<8x32xf32>
    %175 = arith.mulf %172, %135 : vector<8x32xf32>
    %176 = arith.mulf %171, %174 : vector<8x32xf32>
    %177 = arith.addf %175, %176 : vector<8x32xf32>
    %178 = math.tanh %177 : vector<8x32xf32>
    %179 = arith.mulf %173, %178 : vector<8x32xf32>
    %c4_i32 = arith.constant 4 : i32
    %c0_38 = arith.constant 0 : index
    %c0_39 = arith.constant 0 : index
    %180 = vector.load %arg7[%c0_38, %c0_39] : memref<2x8xf32, #tpu.memory_space<vmem>>, vector<2x8xf32>
    %cst_40 = arith.constant dense<0.000000e+00> : vector<2x32xf32>
    %181 = tpu.matmul %180, %179, %cst_40 {dimension_numbers = #tpu.dot_dimension_numbers<[1], [0], [0], [1], [0, 0, 1, 1], [], []>} : vector<2x8xf32>, vector<8x32xf32>, vector<2x32xf32> -> vector<2x32xf32>
    %cst_41 = arith.constant dense<0.000000e+00> : vector<2xf32>
    %182 = vector.multi_reduction <add>, %180, %cst_41 [1] : vector<2x8xf32> to vector<2xf32>
    %183 = vector.shape_cast %182 : vector<2xf32> to vector<2x1xf32>
    %184 = vector.broadcast %183 : vector<2x1xf32> to vector<2x32xf32>
    %185 = arith.divf %181, %184 : vector<2x32xf32>
    %c0_42 = arith.constant 0 : index
    %c0_43 = arith.constant 0 : index
    %186 = vector.load %arg6[%c0_42, %c0_43] : memref<2x5xf32, #tpu.memory_space<vmem>>, vector<2x5xf32>
    %c0_44 = arith.constant 0 : index
    %c0_45 = arith.constant 0 : index
    %187 = vector.load %arg8[%c0_44, %c0_45] : memref<32x5xf32, #tpu.memory_space<vmem>>, vector<32x5xf32>
    %cst_46 = arith.constant dense<0.000000e+00> : vector<2x5xf32>
    %188 = tpu.matmul %185, %187, %cst_46 {dimension_numbers = #tpu.dot_dimension_numbers<[1], [0], [0], [1], [0, 0, 1, 1], [], []>} : vector<2x32xf32>, vector<32x5xf32>, vector<2x5xf32> -> vector<2x5xf32>
    %189 = arith.addf %186, %188 : vector<2x5xf32>
    %cst_47 = arith.constant dense<0xFF800000> : vector<2xf32>
    %190 = vector.multi_reduction <maximumf>, %189, %cst_47 [1] : vector<2x5xf32> to vector<2xf32>
    %191 = vector.shape_cast %190 : vector<2xf32> to vector<2x1xf32>
    %192 = vector.broadcast %191 : vector<2x1xf32> to vector<2x5xf32>
    %193 = arith.subf %189, %192 : vector<2x5xf32>
    %194 = math.exp %193 : vector<2x5xf32>
    %cst_48 = arith.constant dense<0.000000e+00> : vector<2xf32>
    %195 = vector.multi_reduction <add>, %194, %cst_48 [1] : vector<2x5xf32> to vector<2xf32>
    %196 = vector.shape_cast %195 : vector<2xf32> to vector<2x1xf32>
    %197 = math.log %196 : vector<2x1xf32>
    %198 = vector.broadcast %197 : vector<2x1xf32> to vector<2x5xf32>
    %199 = arith.subf %193, %198 : vector<2x5xf32>
    %c0_49 = arith.constant 0 : index
    %c0_50 = arith.constant 0 : index
    %200 = vector.load %arg9[%c0_49, %c0_50] : memref<2x5xf32, #tpu.memory_space<vmem>>, vector<2x5xf32>
    tpu.vector_store %arg9[%c0_49, %c0_50], %199 {strides = array<i32>} : memref<2x5xf32, #tpu.memory_space<vmem>>, vector<2x5xf32>,
    return
  }
}

</mosaic_0001>

<bundles_post_ra>
// kernel: mul.5
= control target key start
LH: loop header
LB: loop body
LE: loop exit
PB: predicated region body
PF: predicated region fallthrough
CT: control target
= control target key end

     0   :  { %vm8_vm0 = vcmask 23552   ;;  %vm14_vm1 = vcmask 48152   ;;  %s42_s0 = inlined_call_operand.vmem [shape: f32[2,3], index: 0, kind: input, shape index: {}]   ;;  %s43_s1 = inlined_call_operand.vmem [shape: f32[6], index: 1, kind: output, shape index: {}]  }
   0x1   :  { %v5_v0 = vld [vmem:[%s42_s0] sm:$0x3]  ;;  %s25_s0 = smov 3  }
   0x2   :  { %6 = vst [vmem:[#allocation1] sm:$0x3] %v5_v0 }
   0x9   :  { %v11_v1 = vld [vmem:[#allocation1 + $0x1] sm:$0x1]   ;;  %v7_v2 = vld [vmem:[#allocation1] sm:$0x1]  }
   0xa   :  { %12 = vrot.lane.b32.xlu0 %v11_v1, %s25_s0  ;;  %9 = vst.msk [vmem:[#allocation0] sm:$0x1] %vm8_vm0, %v7_v2  }
  0x7c   :  { %v13_v3 = vpop.permute.xlu0 %12  }
  0x7d   :  { %15 = vst.msk [vmem:[#allocation0] sm:$0x1] %vm14_vm1, %v13_v3  }
  0x84   :  { %v20_v4 = vld [vmem:[#allocation0] sm:$0x1] }
  0x85   :  { %23 = vst [vmem:[%s43_s1] sm:$0x1] %v20_v4 }

// kernel: lstm_model_forward.1
= control target key start
LH: loop header
LB: loop body
LE: loop exit
PB: predicated region body
PF: predicated region fallthrough
CT: control target
= control target key end

     0   :  { %v1603_v30 = vmov 0.0   ;;  %s1964_s0 = inlined_call_operand.vmem [shape: bf16[32,384], index: 0, kind: input, shape index: {}]   ;;  %s1965_s1 = inlined_call_operand.vmem [shape: bf16[384,128], index: 1, kind: input, shape index: {}]   ;;  %s1966_s2 = inlined_call_operand.vmem [shape: bf16[32,128], index: 2, kind: input, shape index: {}]   ;;  %s1967_s3 = inlined_call_operand.vmem [shape: f32[1,128], index: 3, kind: input, shape index: {}]   ;;  %s1968_s4 = inlined_call_operand.vmem [shape: bf16[64,128], index: 4, kind: input, shape index: {}]   ;;  %s1969_s5 = inlined_call_operand.vmem [shape: f32[1,128], index: 5, kind: input, shape index: {}]   ;;  %s1970_s6 = inlined_call_operand.vmem [shape: f32[2,5], index: 6, kind: input, shape index: {}]   ;;  %s1971_s7 = inlined_call_operand.vmem [shape: f32[2,8], index: 7, kind: input, shape index: {}]   ;;  %s1972_s8 = inlined_call_operand.vmem [shape: f32[32,5], index: 8, kind: input, shape index: {}]   ;;  %s1973_s9 = inlined_call_operand.hbm [shape: f32[2,5], index: 9, kind: output, shape index: {}]  }
   0x1   :  { %v1473_v0 = vld [vmem:[%s1965_s1 + $0x78] sm:$0xff]   ;;  %v1476_v3 = vld [vmem:[%s1965_s1 + $0x70] sm:$0xff]   ;;  %v1479_v6 = vld [vmem:[%s1965_s1 + $0x68] sm:$0xff]  }
   0x2   :  { %v1474_v1 = vld [vmem:[%s1965_s1 + $0xb8] sm:$0xff]   ;;  %1274 = vmatprep.subr.bf16.mxu0 %v1473_v0  ;;  %v1477_v4 = vld [vmem:[%s1965_s1 + $0xb0] sm:$0xff]   ;;  %v1480_v7 = vld [vmem:[%s1965_s1 + $0xa8] sm:$0xff]  }
   0x3   :  { %v1475_v2 = vld [vmem:[%s1965_s1 + $0x38] sm:$0xff]   ;;  %1351 = vmatprep.subr.bf16.mxu1 %v1474_v1  ;;  %v1478_v5 = vld [vmem:[%s1965_s1 + $0x30] sm:$0xff]   ;;  %v1481_v8 = vld [vmem:[%s1965_s1 + $0x28] sm:$0xff]  }
   0x4   :  { %1275 = vmatpush3.bf16.msra.mxu0 %v1475_v2  ;;  %1352 = vmatpush3.bf16.msra.mxu1 %v1474_v1  ;;  %v1482_v9 = vld [vmem:[%s1965_s1 + $0x60] sm:$0xff]   ;;  %v1485_v12 = vld [vmem:[%s1965_s1 + $0x58] sm:$0xff]   ;;  %v1488_v15 = vld [vmem:[%s1965_s1 + $0x50] sm:$0xff]  }
   0x5   :  { %1276 = vmatprep.subr.bf16.mxu0 %v1476_v3  ;;  %1353 = vmatprep.subr.bf16.mxu1 %v1477_v4  ;;  %v1483_v10 = vld [vmem:[%s1965_s1 + $0xa0] sm:$0xff]   ;;  %v1486_v13 = vld [vmem:[%s1965_s1 + $0x98] sm:$0xff]   ;;  %v1489_v16 = vld [vmem:[%s1965_s1 + $0x90] sm:$0xff]  }
   0x6   :  { %v1484_v11 = vld [vmem:[%s1965_s1 + $0x20] sm:$0xff]   ;;  %v1487_v14 = vld [vmem:[%s1965_s1 + $0x18] sm:$0xff]   ;;  %v1490_v17 = vld [vmem:[%s1965_s1 + $0x10] sm:$0xff]  }
   0x7   :  { %v1491_v18 = vld [vmem:[%s1965_s1 + $0x48] sm:$0xff]   ;;  %v1494_v21 = vld [vmem:[%s1965_s1 + $0x40] sm:$0xff]  }
   0x8   :  { %1277 = vmatpush3.bf16.msra.mxu0 %v1478_v5  ;;  %1354 = vmatpush3.bf16.msra.mxu1 %v1477_v4  ;;  %v1492_v19 = vld [vmem:[%s1965_s1 + $0x88] sm:$0xff]   ;;  %v1495_v22 = vld [vmem:[%s1965_s1 + $0x80] sm:$0xff]  }
   0x9   :  { %1278 = vmatprep.subr.bf16.mxu0 %v1479_v6  ;;  %1355 = vmatprep.subr.bf16.mxu1 %v1480_v7  ;;  %v1493_v20 = vld [vmem:[%s1965_s1 + $0x8] sm:$0xff]   ;;  %v1499_v23 = vld [vmem:[%s1964_s0 + $0x4] ss:$12 sps:$4 sm:$0xff]  }
   0xa   :  { %v1500_v24 = vld [vmem:[%s1964_s0 + $0x8] ss:$12 sps:$4 sm:$0xff]   ;;  %305 = vmatprep.mubr.bf16.mxu0 %v1499_v23  ;;  %v1496_v25 = vld [vmem:[%s1965_s1] sm:$0xff]  }
   0xb   :  { %v1497_v26 = vld [vmem:[%s1964_s0] ss:$12 sps:$4 sm:$0xff]   ;;  %1367 = vmatprep.mubr.bf16.mxu1 %v1500_v24  ;;  %v1504_v29 = vld [vmem:[%s1964_s0 + $0x1c] ss:$12 sps:$4 sm:$0xff]  }
   0xc   :  { %1279 = vmatpush3.bf16.msra.mxu0 %v1481_v8  ;;  %1356 = vmatpush3.bf16.msra.mxu1 %v1480_v7  ;;  %v1501_v27 = vld [vmem:[%s1964_s0 + $0x20] ss:$12 sps:$4 sm:$0xff]  }
   0xd   :  { %1280 = vmatprep.subr.bf16.mxu0 %v1482_v9  ;;  %1357 = vmatprep.subr.bf16.mxu1 %v1483_v10  ;;  %v1746_v28 = vld [vmem:[%s1966_s2 + $0x8] sm:$0xff]  }
  0x10   :  { %1281 = vmatpush3.bf16.msra.mxu0 %v1484_v11  ;;  %1358 = vmatpush3.bf16.msra.mxu1 %v1483_v10 }
  0x11   :  { %1282 = vmatprep.subr.bf16.mxu0 %v1485_v12  ;;  %1359 = vmatprep.subr.bf16.mxu1 %v1486_v13 }
  0x14   :  { %1283 = vmatpush3.bf16.msra.mxu0 %v1487_v14  ;;  %1360 = vmatpush3.bf16.msra.mxu1 %v1486_v13 }
  0x15   :  { %1284 = vmatprep.subr.bf16.mxu0 %v1488_v15  ;;  %1361 = vmatprep.subr.bf16.mxu1 %v1489_v16 }
  0x18   :  { %1285 = vmatpush3.bf16.msra.mxu0 %v1490_v17  ;;  %1362 = vmatpush3.bf16.msra.mxu1 %v1489_v16 }
  0x19   :  { %1286 = vmatprep.subr.bf16.mxu0 %v1491_v18  ;;  %1363 = vmatprep.subr.bf16.mxu1 %v1492_v19 }
  0x1c   :  { %1287 = vmatpush3.bf16.msra.mxu0 %v1493_v20  ;;  %1364 = vmatpush3.bf16.msra.mxu1 %v1492_v19 }
  0x1d   :  { %1288 = vmatprep.subr.bf16.mxu0 %v1494_v21  ;;  %1365 = vmatprep.subr.bf16.mxu1 %v1495_v22 }
  0x20   :  { %1289 = vmatpush3.bf16.msra.mxu0 %v1496_v25  ;;  %1366 = vmatpush3.bf16.msra.mxu1 %v1495_v22 }
  0x21   :  { %1371 = vmatprep.subr.bf16.mxu1 %v1603_v30  ;;  %1379 = vmatprep.subr.bf16.mxu0 %v1603_v30 }
  0x22   :  { %14 = vsyncpa [#allocation4], 0  ;;  %v1757_v31 = vld [vmem:[%s1966_s2] sm:$0xff]   ;;  %vm1604_vm0 = vmmov 0   ;;  %v1605_v33 = vmov 0   ;;  %s1607_s30 = smov 32  }
  0x23   :  { %306 = vmatmul.mubr.bf16.vlgmr.msra.gmra.mxu0 %v1497_v26  ;;  %1368 = vmatmul.mubr.bf16.vlgmr.msra.gmra.mxu1 %v1501_v27  ;;  %v1506_v32 = vld [vmem:[%s1964_s0 + $0x18] ss:$12 sps:$4 sm:$0xff]   ;;  %v1219_v37 = vld [vmem:[%s1967_s3] ss:$0 sm:$0xff]  ;;  %s1606_s3 = smov 64   ;;  %v1798_v11 = vld [vmem:[%s1968_s4 + $0x10] sm:$0xff]  }
  0x24   :  { %1372 = vmatpush3.bf16.msra.mxu1 %v1746_v28  ;;  %313 = vmatprep.mubr.bf16.mxu0 %v1504_v29  ;;  %v1792_v10 = vld [vmem:[%s1968_s4 + $0x18] sm:$0xff]   ;;  %v1805_v12 = vld [vmem:[%s1968_s4 + $0x8] sm:$0xff]   ;;  %v1814_v14 = vld [vmem:[%s1968_s4] sm:$0xff]   ;;  %vm401_vm1 = vcmask 261120   ;;  %vm506_vm2 = vcmask 523264   ;;  %vm1106_vm3 = vcmask 58368  }
  0x25   :  { %1373 = vmatprep.subr.bf16.mxu1 %v1603_v30  ;;  %1375 = vmatprep.mubr.msk.bf16.mxu1 %vm1604_vm0, %v1603_v30  ;;  %v1842_v22 = vld [vmem:[%s1969_s5] ss:$0 sm:$0xff]  ;;  %vm1032_vm4 = vcmask 64512   ;;  %vm1191_vm5 = vcmask 33792  }
  0x26   :  { %1380 = vmatpush3.bf16.msra.mxu0 %v1792_v10 }
  0x27   :  { %1381 = vmatprep.subr.bf16.mxu0 %v1603_v30 }
  0x28   :  { %1374 = vmatpush3.bf16.msra.mxu1 %v1757_v31 }
  0x29   :  { %1391 = vmatprep.subr.bf16.mxu1 %v1603_v30 }
  0x2a   :  { %1382 = vmatpush3.bf16.msra.mxu0 %v1798_v11 }
  0x2b   :  { %314 = vmatmul.mubr.bf16.gmra.mxu0 %v1506_v32  ;;  %1376 = vmatmul.mubr.bf16.vlgmr.msra.gmra.mxu1 %v1605_v33 }
  0x2c   :  { %1392 = vmatpush3.bf16.msra.mxu1 %v1746_v28  ;;  %1395 = vmatprep.mubr.msk.bf16.mxu1 %vm1604_vm0, %v1603_v30 }
  0x2d   :  { %1393 = vmatprep.subr.bf16.mxu1 %v1603_v30  ;;  %1387 = vmatprep.mubr.msk.bf16.mxu0 %vm1604_vm0, %v1603_v30 }
  0x2e   :  { %1383 = vmatprep.subr.bf16.mxu0 %v1603_v30 }
  0x2f   :  { %1384 = vmatpush3.bf16.msra.mxu0 %v1805_v12 }
  0x30   :  { %1394 = vmatpush3.bf16.msra.mxu1 %v1757_v31  ;;  %1385 = vmatprep.subr.bf16.mxu0 %v1603_v30 }
  0x31   :  { %1411 = vmatprep.subr.bf16.mxu1 %v1603_v30 }
  0x33   :  { %1386 = vmatpush3.bf16.msra.mxu0 %v1814_v14 }
  0x34   :  { %1399 = vmatprep.subr.bf16.mxu0 %v1603_v30 }
  0xe3   :  { %v1290_v34 = vpop.f32.mrf.mxu0  ;;  %v1369_v35 = vpop.f32.mrf.mxu1 }
  0xe5   :  { %v1291_v36 = vpop.f32.mrf.mxu0  ;;  %v356_v38 = vpop.f32.mrf.mxu1 }
  0xe6   :  { %v1292_v39 = vadd.f32 %v1291_v36, %v1290_v34 }
  0xe7   :  { %v1293_v40 = vpop.f32.mrf.mxu0  ;;  %v1370_v41 = vpop.f32.mrf.mxu1 }
  0xe8   :  { %v308_v42 = vadd.f32 %v1292_v39, %v1219_v37 }
  0xe9   :  { %v1294_v43 = vpop.f32.mrf.mxu0  ;;  %v359_v44 = vpop.f32.mrf.mxu1 }
  0xea   :  { %v357_v45 = vadd.f32 %v356_v38, %v308_v42  ;;  %v1295_v46 = vadd.f32 %v1294_v43, %v1293_v40 }
  0xeb   :  { %v1296_v47 = vpop.f32.mrf.mxu0  ;;  %v439_v48 = vpop.f32.mrf.mxu1 }
  0xec   :  { %v311_v49 = vadd.f32 %v1295_v46, %v1219_v37  ;;  %v445_v50 = vadd.f32 %v439_v48, %v357_v45 }
  0xed   :  { %v1297_v51 = vpop.f32.mrf.mxu0  ;;  %v1377_v52 = vpop.f32.mrf.mxu1 }
  0xee   :  { %v1778_v53 = vadd.f32 %v359_v44, %v311_v49  ;;  %1511 = vtanh.f32 %v445_v50  ;;  %v1298_v54 = vadd.f32 %v1297_v51, %v1296_v47  ;;  %v1252_v1 = vmul.f32 -1.442695, %v445_v50 }
  0xef   :  { %v1299_v55 = vpop.f32.mrf.mxu0  ;;  %v442_v56 = vpop.f32.mrf.mxu1 }
  0xf0   :  { %v316_v57 = vadd.f32 %v1298_v54, %v1219_v37  ;;  %1513 = vpow2.f32 %v1252_v1 }
  0xf1   :  { %v1300_v58 = vpop.f32.mrf.mxu0  ;;  %v1378_v59 = vpop.f32.mrf.mxu1 }
  0xf2   :  { %v1301_v60 = vadd.f32 %v1300_v58, %v1299_v55  ;;  %v1780_v61 = vadd.f32 %v1369_v35, %v316_v57 }
  0xf4   :  { %v319_v62 = vadd.f32 %v1301_v60, %v1219_v37 }
  0xf6   :  { %v1782_v63 = vadd.f32 %v1370_v41, %v319_v62 }
  0xfb   :  { %v1512_v0 = vpop.eup %1511 }
  0xfc   :  { %455 = vrot.lane.b32.xlu0 %v1512_v0, %s1606_s3 }
  0xfd   :  { %v1514_v2 = vpop.eup %1513 }
  0xfe   :  { %v449_v3 = vadd.f32 1.0, %v1514_v2 }
 0x100   :  { %1515 = vrcp.f32 %v449_v3 }
 0x10d   :  { %v1516_v4 = vpop.eup %1515 }
 0x10e   :  { %v453_v7 = vmul.f32 0.0, %v1516_v4 }
 0x16e   :  { %v456_v5 = vpop.permute.xlu0 %455 }
 0x16f   :  { %v458_v6 = vmul.f32 %v1516_v4, %v456_v5 }
 0x171   :  { %460 = vrot.lane.b32.xlu0 %v458_v6, %s1607_s30 }
 0x1e3   :  { %v461_v8 = vpop.permute.xlu0 %460 }
 0x1e4   :  { %v1786_v9 = vadd.f32 %v461_v8, %v453_v7 }
 0x1e6   :  { %1517 = vtanh.f32 %v1786_v9 }
 0x1f3   :  { %v1518_v13 = vpop.eup %1517 }
 0x1f4   :  { %466 = vrot.lane.b32.xlu1 %v1518_v13, %s1606_s3 }
 0x266   :  { %v467_v15 = vpop.permute.xlu1 %466 }
 0x267   :  { %v469_v16 = vmul.f32 %v1516_v4, %v467_v15 }
 0x269   :  { %v576_v17 = vpack.c.bf16 %v469_v16, %v469_v16  ;;  %471 = vrot.lane.b32.xlu1 %v469_v16, %s1607_s30 }
 0x26b   :  { %578 = vrot.lane.b32.xlu0 %v576_v17, %s1607_s30 }
 0x2db   :  { %v472_v18 = vpop.permute.xlu1 %471 }
 0x2dc   :  { %v474_v19 = vsel %vm401_vm1, %v472_v18, 0.0 }
 0x2dd   :  { %v475_v20 = vpack.c.bf16 %v474_v19, %v474_v19  ;;  %v579_v21 = vpop.permute.xlu0 %578 }
 0x2de   :  { %1396 = vmatmul.mubr.msk.bf16.vlgmr.msra.gmra.mxu1 %vm401_vm1, %v579_v21 }
 0x2df   :  { %1388 = vmatmul.mubr.msk.bf16.vlgmr.msra.gmra.mxu0 %vm506_vm2, %v475_v20  ;;  %1412 = vmatpush3.bf16.msra.mxu1 %v1746_v28 }
 0x2e0   :  { %1400 = vmatpush3.bf16.msra.mxu0 %v1792_v10  ;;  %1413 = vmatprep.subr.bf16.mxu1 %v1603_v30 }
 0x2e1   :  { %1401 = vmatprep.subr.bf16.mxu0 %v1603_v30  ;;  %1407 = vmatprep.mubr.msk.bf16.mxu0 %vm1604_vm0, %v1603_v30 }
 0x2e2   :  { %1415 = vmatprep.mubr.msk.bf16.mxu1 %vm1604_vm0, %v1603_v30 }
 0x2e3   :  { %1414 = vmatpush3.bf16.msra.mxu1 %v1757_v31 }
 0x2e4   :  { %1402 = vmatpush3.bf16.msra.mxu0 %v1798_v11  ;;  %1419 = vmatprep.subr.bf16.mxu1 %v1603_v30 }
 0x2e5   :  { %1403 = vmatprep.subr.bf16.mxu0 %v1603_v30 }
 0x2e8   :  { %1404 = vmatpush3.bf16.msra.mxu0 %v1805_v12 }
 0x2e9   :  { %1405 = vmatprep.subr.bf16.mxu0 %v1603_v30 }
 0x2ec   :  { %1406 = vmatpush3.bf16.msra.mxu0 %v1814_v14 }
 0x2ed   :  { %1431 = vmatprep.subr.bf16.mxu0 %v1603_v30 }
 0x39e   :  { %v617_v23 = vpop.f32.mrf.mxu1 }
 0x39f   :  { %v623_v24 = vadd.f32 %v617_v23, %v1778_v53  ;;  %v544_v25 = vpop.f32.mrf.mxu0 }
 0x3a0   :  { %v545_v26 = vadd.f32 %v1842_v22, %v544_v25  ;;  %v1397_v27 = vpop.f32.mrf.mxu1 }
 0x3a1   :  { %1519 = vtanh.f32 %v623_v24  ;;  %v1389_v29 = vpop.f32.mrf.mxu0  ;;  %v1261_v38 = vmul.f32 -1.442695, %v623_v24 }
 0x3a2   :  { %1521 = vtanh.f32 %v545_v26  ;;  %v620_v32 = vpop.f32.mrf.mxu1  ;;  %v1259_v39 = vmul.f32 -1.442695, %v545_v26 }
 0x3a3   :  { %v547_v33 = vpop.f32.mrf.mxu0  ;;  %1523 = vpow2.f32 %v1261_v38 }
 0x3a4   :  { %v1398_v34 = vpop.f32.mrf.mxu1  ;;  %1525 = vpow2.f32 %v1259_v39 }
 0x3a5   :  { %v1390_v35 = vpop.f32.mrf.mxu0 }
 0x3ae   :  { %v1520_v36 = vpop.eup %1519 }
 0x3af   :  { %v1522_v37 = vpop.eup %1521  ;;  %633 = vrot.lane.b32.xlu0 %v1520_v36, %s1606_s3 }
 0x3b0   :  { %559 = vrot.lane.b32.xlu1 %v1522_v37, %s1606_s3  ;;  %v1524_v40 = vpop.eup %1523 }
 0x3b1   :  { %v1526_v41 = vpop.eup %1525  ;;  %v627_v42 = vadd.f32 1.0, %v1524_v40 }
 0x3b2   :  { %v553_v43 = vadd.f32 1.0, %v1526_v41 }
 0x3b3   :  { %1527 = vrcp.f32 %v627_v42 }
 0x3b4   :  { %1529 = vrcp.f32 %v553_v43 }
 0x3c0   :  { %v1528_v44 = vpop.eup %1527 }
 0x3c1   :  { %v1530_v46 = vpop.eup %1529  ;;  %v631_v50 = vmul.f32 %v1528_v44, %v1786_v9 }
 0x3c2   :  { %v557_v52 = vmul.f32 0.0, %v1530_v46 }
 0x421   :  { %v634_v45 = vpop.permute.xlu0 %633 }
 0x422   :  { %v636_v47 = vmul.f32 %v1528_v44, %v634_v45  ;;  %v560_v48 = vpop.permute.xlu1 %559 }
 0x423   :  { %v562_v49 = vmul.f32 %v1530_v46, %v560_v48 }
 0x424   :  { %638 = vrot.lane.b32.xlu0 %v636_v47, %s1607_s30 }
 0x425   :  { %564 = vrot.lane.b32.xlu1 %v562_v49, %s1607_s30 }
 0x496   :  { %v639_v51 = vpop.permute.xlu0 %638 }
 0x497   :  { %v1851_v53 = vadd.f32 %v639_v51, %v631_v50  ;;  %v565_v54 = vpop.permute.xlu1 %564 }
 0x498   :  { %v1853_v55 = vadd.f32 %v565_v54, %v557_v52 }
 0x499   :  { %1531 = vtanh.f32 %v1851_v53 }
 0x49a   :  { %1533 = vtanh.f32 %v1853_v55 }
 0x4a6   :  { %v1532_v56 = vpop.eup %1531 }
 0x4a7   :  { %v1534_v57 = vpop.eup %1533  ;;  %644 = vrot.lane.b32.xlu0 %v1532_v56, %s1606_s3 }
 0x4a8   :  { %570 = vrot.lane.b32.xlu1 %v1534_v57, %s1606_s3 }
 0x519   :  { %v645_v58 = vpop.permute.xlu0 %644 }
 0x51a   :  { %v647_v59 = vmul.f32 %v1528_v44, %v645_v58  ;;  %v571_v60 = vpop.permute.xlu1 %570 }
 0x51b   :  { %v573_v62 = vmul.f32 %v1530_v46, %v571_v60 }
 0x51c   :  { %649 = vrot.lane.b32.xlu1 %v647_v59, %s1607_s30  ;;  %v727_v0 = vpack.c.bf16 %v647_v59, %v647_v59 }
 0x51d   :  { %653 = vrot.lane.b32.xlu0 %v573_v62, %s1606_s3 }
 0x520   :  { %729 = vrot.lane.b32.xlu1 %v727_v0, %s1607_s30 }
 0x58e   :  { %v650_v1 = vpop.permute.xlu1 %649 }
 0x58f   :  { %v654_v2 = vpop.permute.xlu0 %653 }
 0x590   :  { %v656_v3 = vsel %vm401_vm1, %v650_v1, %v654_v2 }
 0x591   :  { %v657_v4 = vpack.c.bf16 %v656_v3, %v656_v3 }
 0x592   :  { %v730_v5 = vpop.permute.xlu1 %729 }
 0x593   :  { %1408 = vmatmul.mubr.msk.bf16.vlgmr.msra.gmra.mxu0 %vm506_vm2, %v657_v4  ;;  %1416 = vmatmul.mubr.msk.bf16.vlgmr.msra.gmra.mxu1 %vm401_vm1, %v730_v5 }
 0x594   :  { %1420 = vmatpush3.bf16.msra.mxu1 %v1792_v10  ;;  %1432 = vmatpush3.bf16.msra.mxu0 %v1746_v28 }
 0x595   :  { %1421 = vmatprep.subr.bf16.mxu1 %v1603_v30  ;;  %1433 = vmatprep.subr.bf16.mxu0 %v1603_v30 }
 0x596   :  { %1427 = vmatprep.mubr.msk.bf16.mxu1 %vm1604_vm0, %v1603_v30  ;;  %1435 = vmatprep.mubr.msk.bf16.mxu0 %vm1604_vm0, %v1603_v30 }
 0x598   :  { %1422 = vmatpush3.bf16.msra.mxu1 %v1798_v11  ;;  %1434 = vmatpush3.bf16.msra.mxu0 %v1757_v31 }
 0x599   :  { %1423 = vmatprep.subr.bf16.mxu1 %v1603_v30  ;;  %1439 = vmatprep.subr.bf16.mxu0 %v1603_v30 }
 0x59c   :  { %1424 = vmatpush3.bf16.msra.mxu1 %v1805_v12 }
 0x59d   :  { %1425 = vmatprep.subr.bf16.mxu1 %v1603_v30 }
 0x5a0   :  { %1426 = vmatpush3.bf16.msra.mxu1 %v1814_v14 }
 0x5a1   :  { %1451 = vmatprep.subr.mxu1 %v1603_v30 }
 0x653   :  { %v695_v28 = vpop.f32.mrf.mxu0  ;;  %v768_v6 = vpop.f32.mrf.mxu1 }
 0x654   :  { %v696_v7 = vadd.f32 %v1842_v22, %v695_v28  ;;  %v774_v8 = vadd.f32 %v768_v6, %v1780_v61 }
 0x655   :  { %v1409_v9 = vpop.f32.mrf.mxu0  ;;  %v1417_v31 = vpop.f32.mrf.mxu1 }
 0x656   :  { %1535 = vtanh.f32 %v696_v7  ;;  %v1263_v20 = vmul.f32 -1.442695, %v696_v7  ;;  %v1265_v21 = vmul.f32 -1.442695, %v774_v8 }
 0x657   :  { %1537 = vtanh.f32 %v774_v8  ;;  %v698_v13 = vpop.f32.mrf.mxu0  ;;  %v771_v15 = vpop.f32.mrf.mxu1 }
 0x658   :  { %1539 = vpow2.f32 %v1263_v20 }
 0x659   :  { %v1410_v16 = vpop.f32.mrf.mxu0  ;;  %v1418_v17 = vpop.f32.mrf.mxu1  ;;  %1541 = vpow2.f32 %v1265_v21 }
 0x663   :  { %v1536_v18 = vpop.eup %1535 }
 0x664   :  { %v1538_v19 = vpop.eup %1537  ;;  %710 = vrot.lane.b32.xlu0 %v1536_v18, %s1606_s3 }
 0x665   :  { %784 = vrot.lane.b32.xlu1 %v1538_v19, %s1606_s3  ;;  %v1540_v23 = vpop.eup %1539 }
 0x666   :  { %v1542_v61 = vpop.eup %1541  ;;  %v704_v24 = vadd.f32 1.0, %v1540_v23 }
 0x667   :  { %v778_v25 = vadd.f32 1.0, %v1542_v61 }
 0x668   :  { %1543 = vrcp.f32 %v704_v24 }
 0x669   :  { %1545 = vrcp.f32 %v778_v25 }
 0x675   :  { %v1544_v26 = vpop.eup %1543 }
 0x676   :  { %v1546_v29 = vpop.eup %1545  ;;  %v708_v35 = vmul.f32 %v1544_v26, %v1853_v55 }
 0x677   :  { %v782_v37 = vmul.f32 %v1546_v29, %v1851_v53 }
 0x6d6   :  { %v711_v27 = vpop.permute.xlu0 %710 }
 0x6d7   :  { %v713_v32 = vmul.f32 %v1544_v26, %v711_v27  ;;  %v785_v33 = vpop.permute.xlu1 %784 }
 0x6d8   :  { %v787_v34 = vmul.f32 %v1546_v29, %v785_v33 }
 0x6d9   :  { %715 = vrot.lane.b32.xlu0 %v713_v32, %s1607_s30 }
 0x6da   :  { %789 = vrot.lane.b32.xlu1 %v787_v34, %s1607_s30 }
 0x74b   :  { %v716_v36 = vpop.permute.xlu0 %715 }
 0x74c   :  { %v1889_v38 = vadd.f32 %v716_v36, %v708_v35  ;;  %v790_v39 = vpop.permute.xlu1 %789 }
 0x74d   :  { %v1891_v40 = vadd.f32 %v790_v39, %v782_v37 }
 0x74e   :  { %1547 = vtanh.f32 %v1889_v38 }
 0x74f   :  { %1549 = vtanh.f32 %v1891_v40 }
 0x75b   :  { %v1548_v41 = vpop.eup %1547 }
 0x75c   :  { %v1550_v42 = vpop.eup %1549  ;;  %721 = vrot.lane.b32.xlu0 %v1548_v41, %s1606_s3 }
 0x75d   :  { %795 = vrot.lane.b32.xlu1 %v1550_v42, %s1606_s3 }
 0x7ce   :  { %v722_v43 = vpop.permute.xlu0 %721 }
 0x7cf   :  { %v724_v44 = vmul.f32 %v1544_v26, %v722_v43  ;;  %v796_v45 = vpop.permute.xlu1 %795 }
 0x7d0   :  { %v798_v46 = vmul.f32 %v1546_v29, %v796_v45 }
 0x7d1   :  { %804 = vrot.lane.b32.xlu1 %v724_v44, %s1606_s3 }
 0x7d2   :  { %800 = vrot.lane.b32.xlu0 %v798_v46, %s1607_s30  ;;  %v878_v47 = vpack.c.bf16 %v798_v46, %v798_v46  ;;  %v1027_v46 = vld [vmem:[%s1971_s7] sm:$0x3] }
 0x7d6   :  { %880 = vrot.lane.b32.xlu0 %v878_v47, %s1607_s30  ;;  %v1107_v47 = vsel %vm1106_vm3, %v1027_v46, 0.0 }
 0x843   :  { %v805_v48 = vpop.permute.xlu1 %804 }
 0x844   :  { %v801_v49 = vpop.permute.xlu0 %800 }
 0x845   :  { %v807_v50 = vsel %vm401_vm1, %v801_v49, %v805_v48 }
 0x846   :  { %v808_v51 = vpack.c.bf16 %v807_v50, %v807_v50 }
 0x848   :  { %v881_v52 = vpop.permute.xlu0 %880  ;;  %1428 = vmatmul.mubr.msk.bf16.vlgmr.msra.gmra.mxu1 %vm506_vm2, %v808_v51  ;;  %v1116_v51 = vld [vmem:[%s1972_s8 + $0x18] sm:$0xff] }
 0x849   :  { %1436 = vmatmul.mubr.msk.bf16.vlgmr.msra.gmra.mxu0 %vm401_vm1, %v881_v52  ;;  %1453 = vmatprep.mubr.msk.f32.mxu1 %vm1604_vm0, %v1603_v30  ;;  %v1115_v52 = vld [vmem:[%s1972_s8 + $0x10] sm:$0xff] }
 0x84a   :  { %1440 = vmatpush3.bf16.msra.mxu0 %v1792_v10  ;;  %1447 = vmatprep.mubr.msk.bf16.mxu0 %vm1604_vm0, %v1603_v30 }
 0x84b   :  { %1441 = vmatprep.subr.bf16.mxu0 %v1603_v30 }
 0x84e   :  { %1442 = vmatpush3.bf16.msra.mxu0 %v1798_v11 }
 0x84f   :  { %1443 = vmatprep.subr.bf16.mxu0 %v1603_v30 }
 0x852   :  { %1444 = vmatpush3.bf16.msra.mxu0 %v1805_v12 }
 0x853   :  { %1445 = vmatprep.subr.bf16.mxu0 %v1603_v30 }
 0x856   :  { %1446 = vmatpush3.bf16.msra.mxu0 %v1814_v14 }
 0x908   :  { %v846_v53 = vpop.f32.mrf.mxu1 }
 0x909   :  { %v847_v54 = vadd.f32 %v1842_v22, %v846_v53  ;;  %v919_v55 = vpop.f32.mrf.mxu0  ;;  %v1114_v53 = vld [vmem:[%s1972_s8 + $0x8] sm:$0xff] }
 0x90a   :  { %v925_v10 = vadd.f32 %v919_v55, %v1782_v63  ;;  %v1429_v56 = vpop.f32.mrf.mxu1 }
 0x90b   :  { %1551 = vtanh.f32 %v847_v54  ;;  %v1437_v57 = vpop.f32.mrf.mxu0  ;;  %v1267_v14 = vmul.f32 -1.442695, %v847_v54  ;;  %v1113_v54 = vld [vmem:[%s1972_s8] sm:$0xff]  ;;  %s1608_s8 = smov [#allocation3]  }
 0x90c   :  { %1553 = vtanh.f32 %v925_v10  ;;  %v849_v58 = vpop.f32.mrf.mxu1  ;;  %v1269_v0 = vmul.f32 -1.442695, %v925_v10 }
 0x90d   :  { %v922_v11 = vpop.f32.mrf.mxu0  ;;  %1555 = vpow2.f32 %v1267_v14 }
 0x90e   :  { %v1430_v59 = vpop.f32.mrf.mxu1  ;;  %1557 = vpow2.f32 %v1269_v0  ;;  %v1112_v11 = vld [vmem:[%s1970_s6] sm:$0x3]  ;;  %s1211_s6 = sshll.u32 %s1608_s8, 4  ;;  %s1212_s6 = int_to_ptr.vmem [resolvable:$true] %s1211_s6 }
 0x90f   :  { %v1438_v60 = vpop.f32.mrf.mxu0  ;;  %s1581_s28 = scalar_lea.vmem %s1212_s6, 32  ;;  %p1586_p1 = scmp.lt.s32.totalorder %s1212_s6, %s1212_s6 }
 0x910   :  { %p1582_p0 = scmp.ne.s32.totalorder %s1212_s6, %s1581_s28  ;;  %p1587_p2 = scmp.lt.s32.totalorder %s1581_s28, %s1581_s28 }
 0x912   :  { %p1588_p3 = por %p1587_p2, %p1586_p1 }
 0x914   :  { %p1589_p4 = pnand %p1588_p3, %p1582_p0 }
 0x918   :  { %v1552_v62 = vpop.eup %1551 }
 0x919   :  { %v1554_v12 = vpop.eup %1553  ;;  %861 = vrot.lane.b32.xlu1 %v1552_v62, %s1606_s3 }
 0x91a   :  { %935 = vrot.lane.b32.xlu0 %v1554_v12, %s1606_s3  ;;  %v1556_v1 = vpop.eup %1555 }
 0x91b   :  { %v1558_v63 = vpop.eup %1557  ;;  %v855_v2 = vadd.f32 1.0, %v1556_v1 }
 0x91c   :  { %v929_v3 = vadd.f32 1.0, %v1558_v63 }
 0x91d   :  { %1559 = vrcp.f32 %v855_v2 }
 0x91e   :  { %1561 = vrcp.f32 %v929_v3 }
 0x92a   :  { %v1560_v4 = vpop.eup %1559 }
 0x92b   :  { %v1562_v28 = vpop.eup %1561  ;;  %v859_v9 = vmul.f32 %v1560_v4, %v1889_v38 }
 0x92c   :  { %v933_v13 = vmul.f32 %v1562_v28, %v1891_v40 }
 0x98b   :  { %v862_v5 = vpop.permute.xlu1 %861 }
 0x98c   :  { %v864_v6 = vmul.f32 %v1560_v4, %v862_v5  ;;  %v936_v7 = vpop.permute.xlu0 %935 }
 0x98d   :  { %v938_v8 = vmul.f32 %v1562_v28, %v936_v7 }
 0x98e   :  { %866 = vrot.lane.b32.xlu1 %v864_v6, %s1607_s30 }
 0x98f   :  { %940 = vrot.lane.b32.xlu0 %v938_v8, %s1607_s30 }
 0xa00   :  { %v867_v31 = vpop.permute.xlu1 %866 }
 0xa01   :  { %v869_v15 = vadd.f32 %v867_v31, %v859_v9  ;;  %v941_v16 = vpop.permute.xlu0 %940 }
 0xa02   :  { %v943_v17 = vadd.f32 %v941_v16, %v933_v13 }
 0xa03   :  { %1563 = vtanh.f32 %v869_v15 }
 0xa04   :  { %1565 = vtanh.f32 %v943_v17 }
 0xa10   :  { %v1564_v18 = vpop.eup %1563 }
 0xa11   :  { %v1566_v19 = vpop.eup %1565  ;;  %872 = vrot.lane.b32.xlu1 %v1564_v18, %s1606_s3 }
 0xa12   :  { %946 = vrot.lane.b32.xlu0 %v1566_v19, %s1606_s3 }
 0xa83   :  { %v873_v20 = vpop.permute.xlu1 %872 }
 0xa84   :  { %v875_v21 = vmul.f32 %v1560_v4, %v873_v20  ;;  %v947_v23 = vpop.permute.xlu0 %946 }
 0xa85   :  { %v949_v61 = vmul.f32 %v1562_v28, %v947_v23 }
 0xa86   :  { %955 = vrot.lane.b32.xlu0 %v875_v21, %s1606_s3 }
 0xa87   :  { %951 = vrot.lane.b32.xlu1 %v949_v61, %s1607_s30 }
 0xaf8   :  { %v956_v24 = vpop.permute.xlu0 %955 }
 0xaf9   :  { %v952_v25 = vpop.permute.xlu1 %951 }
 0xafa   :  { %v958_v26 = vsel %vm401_vm1, %v952_v25, %v956_v24 }
 0xafb   :  { %v959_v27 = vpack.c.bf16 %v958_v26, %v958_v26 }
 0xafd   :  { %1448 = vmatmul.mubr.msk.bf16.vlgmr.msra.gmra.mxu0 %vm506_vm2, %v959_v27 }
 0xbbd   :  { %v997_v29 = vpop.f32.mrf.mxu0 }
 0xbbe   :  { %v998_v32 = vadd.f32 %v1842_v22, %v997_v29 }
 0xbbf   :  { %v1449_v33 = vpop.f32.mrf.mxu0 }
 0xbc0   :  { %1567 = vtanh.f32 %v998_v32  ;;  %v1271_v37 = vmul.f32 -1.442695, %v998_v32 }
 0xbc1   :  { %v1000_v34 = vpop.f32.mrf.mxu0 }
 0xbc2   :  { %1569 = vpow2.f32 %v1271_v37 }
 0xbc3   :  { %v1450_v35 = vpop.f32.mrf.mxu0 }
 0xbcd   :  { %v1568_v36 = vpop.eup %1567 }
 0xbce   :  { %1012 = vrot.lane.b32.xlu1 %v1568_v36, %s1606_s3 }
 0xbcf   :  { %v1570_v38 = vpop.eup %1569 }
 0xbd0   :  { %v1006_v39 = vadd.f32 1.0, %v1570_v38 }
 0xbd2   :  { %1571 = vrcp.f32 %v1006_v39 }
 0xbdf   :  { %v1572_v40 = vpop.eup %1571 }
 0xbe0   :  { %v1010_v43 = vmul.f32 %v1572_v40, %v869_v15 }
 0xc40   :  { %v1013_v41 = vpop.permute.xlu1 %1012 }
 0xc41   :  { %v1015_v42 = vmul.f32 %v1572_v40, %v1013_v41 }
 0xc43   :  { %1017 = vrot.lane.b32.xlu0 %v1015_v42, %s1607_s30 }
 0xcb5   :  { %v1018_v44 = vpop.permute.xlu0 %1017 }
 0xcb6   :  { %v1020_v22 = vadd.f32 %v1018_v44, %v1010_v43 }
 0xcb8   :  { %1573 = vtanh.f32 %v1020_v22 }
 0xcc5   :  { %v1574_v45 = vpop.eup %1573 }
 0xcc6   :  { %1023 = vrot.lane.b32.xlu1 %v1574_v45, %s1606_s3 }
 0xcea   :  { %1108 = vadd.xlane.f32.xlu1 %v1107_v47 }
 0xd38   :  { %v1024_v48 = vpop.permute.xlu1 %1023 }
 0xd39   :  { %v1026_v49 = vmul.f32 %v1572_v40, %v1024_v48 }
 0xd3b   :  { %1029 = vrot.lane.b32.xlu0 %v1026_v49, %s1607_s30 }
 0xd73   :  { %v1109_v55 = vpop.xlane.xlu1 %1108 }
 0xd74   :  { %1575 = vrcp.f32 %v1109_v55 }
 0xd81   :  { %v1576_v10 = vpop.eup %1575 }
 0xdad   :  { %v1030_v50 = vpop.permute.xlu0 %1029 }
 0xdae   :  { %1452 = vmatpush3.msra.mxu1 %v1030_v50 }
 0xdaf   :  { %1454 = vmatmul.mubr.msk.f32.vlgmr.msra.gmra.mxu1 %vm1032_vm4, %v1027_v46  ;;  %1456 = vmatprep.subr.mxu1 %v1603_v30 }
 0xdb0   :  { %1457 = vmatpush3.msra.mxu1 %v1116_v51  ;;  %1464 = vmatprep.mubr.msk.f32.mxu1 %vm1604_vm0, %v1603_v30 }
 0xdb1   :  { %1458 = vmatprep.subr.mxu1 %v1603_v30 }
 0xdb2   :  { %1459 = vmatpush3.msra.mxu1 %v1115_v52 }
 0xdb3   :  { %1460 = vmatprep.subr.mxu1 %v1603_v30 }
 0xdb4   :  { %1461 = vmatpush3.msra.mxu1 %v1114_v53 }
 0xdb5   :  { %1462 = vmatprep.subr.mxu1 %v1603_v30 }
 0xdb6   :  { %1463 = vmatpush3.msra.mxu1 %v1113_v54 }
 0xe6f   :  { %v1102_v56 = vpop.f32.mrf.mxu1 }
 0xe70   :  { %v1111_v57 = vmul.f32 %v1576_v10, %v1102_v56 }
 0xe71   :  { %v1455_v58 = vpop.f32.mrf.mxu1 }
 0xe72   :  { %1465 = vmatmul.mubr.msk.f32.vlgmr.msra.gmra.mxu1 %vm401_vm1, %v1111_v57 }
 0xf32   :  { %v1186_v59 = vpop.f32.mrf.mxu1 }
 0xf33   :  { %v1190_v30 = vadd.f32 %v1186_v59, %v1112_v11 }
 0xf34   :  { %v1466_v60 = vpop.f32.mrf.mxu1 }
 0xf35   :  { %v1192_v62 = vsel %vm1191_vm5, %v1190_v30, -inf }
 0xf36   :  { %1193 = vmax.xlane.f32.xlu0 %v1192_v62 }
 0xfbf   :  { %v1194_v12 = vpop.xlane.xlu0 %1193 }
 0xfc0   :  { %v1195_v14 = vsub.f32 %v1190_v30, %v1194_v12 }
 0xfc2   :  { %v1196_v0 = vmul.f32 1.442695, %v1195_v14 }
 0xfc4   :  { %1577 = vpow2.f32 %v1196_v0 }
 0xfd1   :  { %v1578_v1 = vpop.eup %1577 }
 0xfd2   :  { %v1198_v63 = vsel %vm1191_vm5, %v1578_v1, 0.0 }
 0xfd3   :  { %1199 = vadd.xlane.f32.xlu0 %v1198_v63 }
0x105c   :  { %v1200_v2 = vpop.xlane.xlu0 %1199 }
0x105d   :  { %1579 = vlog2.f32 %v1200_v2 }
0x106a   :  { %v1580_v3 = vpop.eup %1579 }
0x106b   :  { %v1202_v4 = vmul.f32 0.6931472, %v1580_v3 }
0x106d   :  { %v1203_v5 = vsub.f32 %v1195_v14, %v1202_v4 }
0x106f   :  { %1204 = vst.msk [vmem:[#allocation3] sm:$0x3] %vm1191_vm5, %v1203_v5 }
0x1070   :  { %1592 = shalt.err (!%p1589_p4)
}
0x1071   :  { %1214 = dma.vmem_to_hbm [thread:$0]  %s1212_s6, 32, %s1973_s9, [#allocation4]  }
0x1072   :  { %1601 = dma.done.wait [#allocation4], 32  }
0x1073   :  { %1602 = vsyncadd [#allocation4], 4294967264 }
0x1074   :  { %1218 = vsyncpa [#allocation4], 1 }

</bundles_post_ra>
